<compile_context>
chip_gen: v6e
topology: v6e:2x2x1
jax: 0.10.0
libtpu: 0.0.40
codegen_flags: <defaults>
</compile_context>

<pallas_src>
import jax
import jax.numpy as jnp
from jax.experimental import pallas as pl
from jax.experimental.pallas import tpu as pltpu


def attention_kernel(vb_ref, qm_ref, vw_ref, keys_ref, values_ref, mask_ref,
                     out_ref, attn_ref):
    # vb_ref:     (1,)        f32 in SMEM (bias of the v-linear, softmax-invariant)
    # qm_ref:     (BM, Da)    query already mapped to attention space
    # vw_ref:     (1, Da)     weight of the v-linear
    # keys_ref:   (BM, T, Da)
    # values_ref: (BM, T, Dv)
    # mask_ref:   (BM, T)     int32, nonzero == masked (-inf before softmax)
    _, _, da = keys_ref.shape

    # tanh(keys + U*Q)                                   (BM, T, Da)   VPU + EUP
    x = keys_ref[...] + qm_ref[...][:, None, :]
    th = jnp.tanh(x)

    # v^T . tanh(...) as multiply + lane reduce over Da  (BM, T)       VPU + XLU
    vw = vw_ref[...].reshape(1, 1, da)
    scores = jnp.sum(th * vw, axis=-1) + vb_ref[0]

    # masked_fill(mask, -inf)
    scores = jnp.where(mask_ref[...] != 0, -jnp.inf, scores)

    # softmax over T (EUP exp + approx reciprocal)
    m = jnp.max(scores, axis=-1, keepdims=True)
    e = jnp.exp(scores - m)
    s = jnp.sum(e, axis=-1, keepdims=True)
    probs = e * pl.reciprocal(s, approx=True)            # (BM, T)

    # weighted sum of values: multiply + sublane reduce over T  (BM, Dv)
    out = jnp.sum(probs[:, :, None] * values_ref[...], axis=1)

    out_ref[...] = out.astype(out_ref.dtype)
    attn_ref[...] = probs.astype(attn_ref.dtype)


def _choose_block_b(B, T, Da, Dv, vmem_budget_bytes=20 << 20):
    """Largest batch block keeping double-buffered blocks under the VMEM budget."""
    # f32 bytes per batch row: double-buffered inputs (keys, values, q_map, mask)
    # + outputs (out, attn).
    per_row = 4 * (2 * (T * Da + T * Dv + Da + T) + (Dv + T))
    bm = int(min(vmem_budget_bytes // max(per_row, 1), 256))
    if B <= bm:
        return B                       # single block == full array dim (layout-legal)
    return max(8, (bm // 8) * 8)       # sublane multiple


def attention_forward(query, keys, values, mask, Wq, bq, vw, vb):
    B, _ = query.shape
    _, T, Da = keys.shape
    Dv = values.shape[-1]

    # ---- hoisted: one batched MXU-friendly matmul in XLA --------------------
    q_map = (query @ Wq.T + bq.reshape(1, Da)).astype(jnp.float32)   # (B, Da)

    vw2 = vw.reshape(1, Da).astype(jnp.float32)
    vb1 = vb.reshape(1).astype(jnp.float32)          # scalar -> SMEM
    mask_i = mask.astype(jnp.int32)
    keys_f = keys.astype(jnp.float32)
    values_f = values.astype(jnp.float32)

    # ---- batch-block tiling --------------------------------------------------
    bm = _choose_block_b(B, T, Da, Dv)
    b_pad = pl.cdiv(B, bm) * bm
    if b_pad != B:
        pad = b_pad - B
        q_map = jnp.pad(q_map, ((0, pad), (0, 0)))
        keys_f = jnp.pad(keys_f, ((0, pad), (0, 0), (0, 0)))
        values_f = jnp.pad(values_f, ((0, pad), (0, 0), (0, 0)))
        mask_i = jnp.pad(mask_i, ((0, pad), (0, 0)))   # padded rows unmasked -> finite
    grid = (b_pad // bm,)

    out_shapes = (
        jax.ShapeDtypeStruct((b_pad, Dv), jnp.float32),
        jax.ShapeDtypeStruct((b_pad, T), jnp.float32),
    )

    grid_spec = pltpu.PrefetchScalarGridSpec(
        num_scalar_prefetch=0,
        grid=grid,
        in_specs=[
            pl.BlockSpec(memory_space=pltpu.MemorySpace.SMEM),  # vb scalar
            pl.BlockSpec((bm, Da), lambda b: (b, 0)),           # q_map
            pl.BlockSpec((1, Da), lambda b: (0, 0)),            # vw
            pl.BlockSpec((bm, T, Da), lambda b: (b, 0, 0)),     # keys
            pl.BlockSpec((bm, T, Dv), lambda b: (b, 0, 0)),     # values
            pl.BlockSpec((bm, T), lambda b: (b, 0)),            # mask
        ],
        out_specs=[
            pl.BlockSpec((bm, Dv), lambda b: (b, 0)),           # output
            pl.BlockSpec((bm, T), lambda b: (b, 0)),            # attention weights
        ],
    )

    out, attn = pl.pallas_call(
        attention_kernel,
        out_shape=out_shapes,
        grid_spec=grid_spec,
        compiler_params=pltpu.CompilerParams(
            dimension_semantics=("parallel",),
            vmem_limit_bytes=48 << 20),
    )(vb1, q_map, vw2, keys_f, values_f, mask_i)

    return out[:B], attn[:B]


def attention_reference(query, keys, values, mask, Wq, bq, vw, vb):
    """Pure-JAX reference matching the PyTorch forward."""
    q_map = query @ Wq.T + bq                          # (B, Da)
    x = keys + q_map[:, None, :]                       # (B, T, Da)
    scores = jnp.tanh(x) @ vw[0] + vb[0]               # (B, T)
    scores = jnp.where(mask, -jnp.inf, scores)
    probs = jax.nn.softmax(scores, axis=-1)
    out = jnp.einsum('bt,btd->bd', probs, values)
    return out, probs


if __name__ == "__main__":
    B, T = 2, 8
    query_size = 32
    attention_size = 32   # keys / values feature dim

    key = jax.random.PRNGKey(0)
    k1, k2, k3, k4, k5, k6, k7 = jax.random.split(key, 7)

    # deterministic parameter init (shapes from nn.Linear in __init__)
    Wq = jax.random.normal(k1, (attention_size, query_size), jnp.float32) * 0.1
    bq = jax.random.normal(k2, (attention_size,), jnp.float32) * 0.1
    vw = jax.random.normal(k3, (1, attention_size), jnp.float32) * 0.1
    vb = jax.random.normal(k4, (1,), jnp.float32) * 0.1

    # inputs
    query = jax.random.normal(k5, (B, query_size), jnp.float32)
    keys = jax.random.normal(k6, (B, T, attention_size), jnp.float32)
    values = jax.random.normal(k7, (B, T, attention_size), jnp.float32)
    # mask: True == padded position (filled with -inf)
    mask = jnp.array(
        [[False] * (T - 2) + [True, True],
         [False] * T],
        dtype=jnp.bool_)

    out, attn = attention_forward(query, keys, values, mask, Wq, bq, vw, vb)
    out = jax.block_until_ready(out)
    attn = jax.block_until_ready(attn)

    out_ref, attn_ref = attention_reference(query, keys, values, mask, Wq, bq, vw, vb)

    # Slightly looser tolerance because the softmax denominator uses the EUP
    # approximate reciprocal (pl.reciprocal(approx=True)).
    assert jnp.allclose(out, out_ref, atol=1e-3, rtol=1e-3)
    assert jnp.allclose(attn, attn_ref, atol=1e-3, rtol=1e-3)
    print("KERNEL_OK")
</pallas_src>

<mosaic_0001>
module attributes {stable_mosaic.version = 11 : i64} {
  func.func @attention_kernel(%arg0: i32, %arg1: memref<1xf32, #tpu.memory_space<smem>>, %arg2: memref<2x32xf32, #tpu.memory_space<vmem>>, %arg3: memref<1x32xf32, #tpu.memory_space<vmem>>, %arg4: memref<2x8x32xf32, #tpu.memory_space<vmem>>, %arg5: memref<2x8x32xf32, #tpu.memory_space<vmem>>, %arg6: memref<2x8xi32, #tpu.memory_space<vmem>>, %arg7: memref<2x32xf32, #tpu.memory_space<vmem>>, %arg8: memref<2x8xf32, #tpu.memory_space<vmem>>) attributes {dimension_semantics = [#tpu.dimension_semantics<parallel>], iteration_bounds = array<i64: 1>, scalar_prefetch = 0 : i64, scratch_operands = 0 : i64, tpu.core_type = #tpu.core_type<tc>, window_params = [{transform_indices = @transform_0, window_bounds = array<i64: 1>}, {transform_indices = @transform_1, window_bounds = array<i64: 2, 32>}, {pipeline_mode = #tpu.pipeline_mode<synchronous>, transform_indices = @transform_2, window_bounds = array<i64: 1, 32>}, {transform_indices = @transform_3, window_bounds = array<i64: 2, 8, 32>}, {transform_indices = @transform_4, window_bounds = array<i64: 2, 8, 32>}, {transform_indices = @transform_5, window_bounds = array<i64: 2, 8>}, {transform_indices = @transform_6, window_bounds = array<i64: 2, 32>}, {transform_indices = @transform_7, window_bounds = array<i64: 2, 8>}]} {
    %c0 = arith.constant 0 : index
    %c0_0 = arith.constant 0 : index
    %c0_1 = arith.constant 0 : index
    %0 = vector.load %arg4[%c0, %c0_0, %c0_1] : memref<2x8x32xf32, #tpu.memory_space<vmem>>, vector<2x8x32xf32>
    %c0_2 = arith.constant 0 : index
    %c0_3 = arith.constant 0 : index
    %1 = vector.load %arg2[%c0_2, %c0_3] : memref<2x32xf32, #tpu.memory_space<vmem>>, vector<2x32xf32>
    %2 = vector.shape_cast %1 : vector<2x32xf32> to vector<2x1x32xf32>
    %3 = vector.broadcast %2 : vector<2x1x32xf32> to vector<2x8x32xf32>
    %4 = arith.addf %0, %3 : vector<2x8x32xf32>
    %5 = math.tanh %4 : vector<2x8x32xf32>
    %c0_4 = arith.constant 0 : index
    %c0_5 = arith.constant 0 : index
    %6 = vector.load %arg3[%c0_4, %c0_5] : memref<1x32xf32, #tpu.memory_space<vmem>>, vector<1x32xf32>
    %7 = vector.shape_cast %6 : vector<1x32xf32> to vector<1x1x32xf32>
    %8 = vector.broadcast %7 : vector<1x1x32xf32> to vector<2x8x32xf32>
    %9 = arith.mulf %5, %8 : vector<2x8x32xf32>
    %cst = arith.constant dense<0.000000e+00> : vector<2x8xf32>
    %10 = vector.multi_reduction <add>, %9, %cst [2] : vector<2x8x32xf32> to vector<2x8xf32>
    %c0_6 = arith.constant 0 : index
    %11 = memref.load %arg1[%c0_6] : memref<1xf32, #tpu.memory_space<smem>>
    %12 = vector.broadcast %11 : f32 to vector<2x8xf32>
    %13 = arith.addf %10, %12 : vector<2x8xf32>
    %c0_7 = arith.constant 0 : index
    %c0_8 = arith.constant 0 : index
    %14 = vector.load %arg6[%c0_7, %c0_8] : memref<2x8xi32, #tpu.memory_space<vmem>>, vector<2x8xi32>
    %c0_i32 = arith.constant 0 : i32
    %15 = vector.broadcast %c0_i32 : i32 to vector<2x8xi32>
    %16 = arith.cmpi ne, %14, %15 : vector<2x8xi32>
    %cst_9 = arith.constant 0xFF800000 : f32
    %17 = vector.broadcast %cst_9 : f32 to vector<2x8xf32>
    %18 = arith.select %16, %17, %13 : vector<2x8xi1>, vector<2x8xf32>
    %cst_10 = arith.constant dense<0xFF800000> : vector<2xf32>
    %19 = vector.multi_reduction <maximumf>, %18, %cst_10 [1] : vector<2x8xf32> to vector<2xf32>
    %20 = vector.shape_cast %19 : vector<2xf32> to vector<2x1xf32>
    %21 = vector.broadcast %20 : vector<2x1xf32> to vector<2x8xf32>
    %22 = arith.subf %18, %21 : vector<2x8xf32>
    %23 = math.exp %22 : vector<2x8xf32>
    %cst_11 = arith.constant dense<0.000000e+00> : vector<2xf32>
    %24 = vector.multi_reduction <add>, %23, %cst_11 [1] : vector<2x8xf32> to vector<2xf32>
    %25 = vector.shape_cast %24 : vector<2xf32> to vector<2x1xf32>
    %26 = tpu.reciprocal %25 {approx = true} : vector<2x1xf32> -> vector<2x1xf32>
    %27 = vector.broadcast %26 : vector<2x1xf32> to vector<2x8xf32>
    %28 = arith.mulf %23, %27 : vector<2x8xf32>
    %29 = vector.shape_cast %28 : vector<2x8xf32> to vector<2x8x1xf32>
    %c0_12 = arith.constant 0 : index
    %c0_13 = arith.constant 0 : index
    %c0_14 = arith.constant 0 : index
    %30 = vector.load %arg5[%c0_12, %c0_13, %c0_14] : memref<2x8x32xf32, #tpu.memory_space<vmem>>, vector<2x8x32xf32>
    %31 = vector.broadcast %29 : vector<2x8x1xf32> to vector<2x8x32xf32>
    %32 = arith.mulf %31, %30 : vector<2x8x32xf32>
    %cst_15 = arith.constant dense<0.000000e+00> : vector<2x32xf32>
    %33 = vector.multi_reduction <add>, %32, %cst_15 [1] : vector<2x8x32xf32> to vector<2x32xf32>
    %c0_16 = arith.constant 0 : index
    %c0_17 = arith.constant 0 : index
    %34 = vector.load %arg7[%c0_16, %c0_17] : memref<2x32xf32, #tpu.memory_space<vmem>>, vector<2x32xf32>
    tpu.vector_store %arg7[%c0_16, %c0_17], %33 {strides = array<i32>} : memref<2x32xf32, #tpu.memory_space<vmem>>, vector<2x32xf32>,
    %c0_18 = arith.constant 0 : index
    %c0_19 = arith.constant 0 : index
    %35 = vector.load %arg8[%c0_18, %c0_19] : memref<2x8xf32, #tpu.memory_space<vmem>>, vector<2x8xf32>
    tpu.vector_store %arg8[%c0_18, %c0_19], %28 {strides = array<i32>} : memref<2x8xf32, #tpu.memory_space<vmem>>, vector<2x8xf32>,
    return
  }
  func.func @transform_0(%arg0: i32) -> i32 {
    %c0_i32 = arith.constant 0 : i32
    %c0_i32_0 = arith.constant 0 : i32
    return %c0_i32 : i32
  }
  func.func @transform_1(%arg0: i32) -> (i32, i32) {
    %c0_i32 = arith.constant 0 : i32
    %c0_i32_0 = arith.constant 0 : i32
    return %arg0, %c0_i32 : i32, i32
  }
  func.func @transform_2(%arg0: i32) -> (i32, i32) {
    %c0_i32 = arith.constant 0 : i32
    %c0_i32_0 = arith.constant 0 : i32
    %c0_i32_1 = arith.constant 0 : i32
    return %c0_i32, %c0_i32_0 : i32, i32
  }
  func.func @transform_3(%arg0: i32) -> (i32, i32, i32) {
    %c0_i32 = arith.constant 0 : i32
    %c0_i32_0 = arith.constant 0 : i32
    %c0_i32_1 = arith.constant 0 : i32
    return %arg0, %c0_i32, %c0_i32_0 : i32, i32, i32
  }
  func.func @transform_4(%arg0: i32) -> (i32, i32, i32) {
    %c0_i32 = arith.constant 0 : i32
    %c0_i32_0 = arith.constant 0 : i32
    %c0_i32_1 = arith.constant 0 : i32
    return %arg0, %c0_i32, %c0_i32_0 : i32, i32, i32
  }
  func.func @transform_5(%arg0: i32) -> (i32, i32) {
    %c0_i32 = arith.constant 0 : i32
    %c0_i32_0 = arith.constant 0 : i32
    return %arg0, %c0_i32 : i32, i32
  }
  func.func @transform_6(%arg0: i32) -> (i32, i32) {
    %c0_i32 = arith.constant 0 : i32
    %c0_i32_0 = arith.constant 0 : i32
    return %arg0, %c0_i32 : i32, i32
  }
  func.func @transform_7(%arg0: i32) -> (i32, i32) {
    %c0_i32 = arith.constant 0 : i32
    %c0_i32_0 = arith.constant 0 : i32
    return %arg0, %c0_i32 : i32, i32
  }
}

</mosaic_0001>

<bundles_post_ra>
// kernel: tpu_custom_call.1
= control target key start
LH: loop header
LB: loop body
LE: loop exit
PB: predicated region body
PF: predicated region fallthrough
CT: control target
= control target key end

     0   :  { %14 = vsyncpa [#allocation4], 0  ;;  %s400_s0 = inlined_call_operand.<no memory space> [shape: f32[1], index: 0, kind: input, shape index: {}]   ;;  %s401_s1 = inlined_call_operand.vmem [shape: f32[2,32], index: 1, kind: input, shape index: {}]   ;;  %s402_s2 = inlined_call_operand.vmem [shape: f32[1,32], index: 2, kind: input, shape index: {}]   ;;  %s403_s3 = inlined_call_operand.hbm [shape: f32[2,8,32], index: 3, kind: input, shape index: {}]   ;;  %s404_s4 = inlined_call_operand.hbm [shape: f32[2,8,32], index: 4, kind: input, shape index: {}]   ;;  %s405_s5 = inlined_call_operand.vmem [shape: s32[2,8], index: 5, kind: input, shape index: {}]   ;;  %s406_s6 = inlined_call_operand.hbm [shape: f32[2,32], index: 6, kind: output, shape index: {0}]   ;;  %s407_s7 = inlined_call_operand.hbm [shape: f32[2,8], index: 7, kind: output, shape index: {1}]  }
   0x1   :  { %15 = vsyncpa [#allocation7], 0 }
   0x2   :  { %16 = vsyncpa [#allocation5], 0 }
   0x3   :  { %17 = vsyncpa [#allocation10], 0  ;;  %s320_s24 = smov [#allocation3]  }
   0x4   :  { %s29_s25 = sshll.u32 %s320_s24, 4  ;;  %s30_s25 = int_to_ptr.vmem [resolvable:$true] %s29_s25 }
   0x5   :  { %s240_s26 = scalar_lea.vmem %s30_s25, 256  ;;  %p245_p1 = scmp.lt.s32.totalorder %s30_s25, %s30_s25 }
   0x6   :  { %p241_p0 = scmp.ne.s32.totalorder %s30_s25, %s240_s26  ;;  %p246_p2 = scmp.lt.s32.totalorder %s240_s26, %s240_s26 }
   0x8   :  { %p247_p3 = por %p246_p2, %p245_p1 }
   0xa   :  { %p248_p4 = pnand %p247_p3, %p241_p0 }
   0xc   :  { %251 = shalt.err (!%p248_p4)
}
   0xd   :  { %s321_s27 = smov 128   ;;  %s322_s28 = smov 8  }
   0xe   :  { %35 = dma.hbm_to_vmem [thread:$0]  %s403_s3, 256, %s30_s25, [#allocation4], %s321_s27, %s321_s27, %s322_s28  }
   0xf   :  { %s323_s8 = smov [#allocation6]  }
  0x10   :  { %s41_s9 = sshll.u32 %s323_s8, 4  ;;  %s42_s9 = int_to_ptr.vmem [resolvable:$true] %s41_s9 }
  0x11   :  { %s260_s10 = scalar_lea.vmem %s42_s9, 256  ;;  %p265_p6 = scmp.lt.s32.totalorder %s42_s9, %s42_s9 }
  0x12   :  { %p261_p5 = scmp.ne.s32.totalorder %s42_s9, %s260_s10  ;;  %p266_p7 = scmp.lt.s32.totalorder %s260_s10, %s260_s10 }
  0x14   :  { %p267_p8 = por %p266_p7, %p265_p6 }
  0x16   :  { %p268_p9 = pnand %p267_p8, %p261_p5 }
  0x18   :  { %271 = shalt.err (!%p268_p9)
}
  0x19   :  { %47 = dma.hbm_to_vmem [thread:$0]  %s404_s4, 256, %s42_s9, [#allocation7], %s321_s27, %s321_s27, %s322_s28  }
  0x1a   :  { %312 = dma.done.wait [#allocation4], 256  }
  0x1b   :  { %313 = vsyncadd [#allocation4], 4294967040 }
  0x1c   :  { %314 = dma.done.wait [#allocation7], 256  }
  0x1d   :  { %315 = vsyncadd [#allocation7], 4294967040  ;;  %v71_v0 = vlaneseq  ;;  %v324_v1 = vmov 1966171168   ;;  %v56_v10 = vld [vmem:[#allocation3] sm:$0xff]  ;;  %v57_v13 = vld [vmem:[#allocation3 + $0x8] sm:$0xff]  ;;  %v113_v25 = vstv %s400_s0 }
  0x1e   :  { %v69_v2 = vunpack.c.l.s4 %v324_v1  ;;  %v215_v7 = vld.sshfl [vmem:[%s401_s1] sm:$0x11 pattern:$0x75316420]  ;;  %vm105_vm0 = vcmask 261120   ;;  %vm130_vm1 = vcmask 1041409  }
  0x1f   :  { %v72_v3 = vshrl.u32 %v71_v0, 7  ;;  %v67_v8 = vcombine.high %v215_v7, %v215_v7  ;;  %v216_v17 = vld [vmem:[%s402_s2] ss:$0 sm:$0xff]  ;;  %v121_v24 = vand.u32 127, %v71_v0  ;;  %vm134_vm3 = vcmask 58368   ;;  %s325_s0 = smov [#allocation9]  }
  0x20   :  { %v70_v4 = vunpack.c.0.s8 %v69_v2  ;;  %v116_v30 = vld [vmem:[%s405_s5] sm:$0x3]  ;;  %s201_s5 = sshll.u32 %s325_s0, 4  ;;  %s202_s5 = int_to_ptr.vmem [resolvable:$true] %s201_s5 }
  0x21   :  { %v84_v6 = vsub.s32 0, %v72_v3  ;;  %v124_v27 = vsub.s32 %v121_v24, %v72_v3  ;;  %vm117_vm2 = vcmp.ne.s32.totalorder %v116_v30, 0  ;;  %v155_v43 = vsub.s32 1, %v72_v3  ;;  %s272_s17 = scalar_lea.vmem %s202_s5, 32  ;;  %p277_p11 = scmp.lt.s32.totalorder %s202_s5, %s202_s5 }
  0x22   :  { %v73_v5 = vsub.s32 %v70_v4, %v72_v3  ;;  %p273_p10 = scmp.ne.s32.totalorder %s202_s5, %s272_s17  ;;  %p278_p12 = scmp.lt.s32.totalorder %s272_s17, %s272_s17 }
  0x24   :  { %v74_v9 = vrot.slane %v215_v7, %v73_v5  ;;  %v81_v12 = vrot.slane %v67_v8, %v73_v5  ;;  %p279_p13 = por %p278_p12, %p277_p11 }
  0x26   :  { %v85_v11 = vrot.slane %v74_v9, %v84_v6  ;;  %v89_v15 = vrot.slane %v81_v12, %v84_v6  ;;  %p280_p0 = pnand %p279_p13, %p273_p10 }
  0x28   :  { %v92_v14 = vadd.f32 %v85_v11, %v56_v10  ;;  %v93_v16 = vadd.f32 %v89_v15, %v57_v13 }
  0x2a   :  { %224 = vtanh.f32 %v92_v14 }
  0x2b   :  { %226 = vtanh.f32 %v93_v16 }
  0x37   :  { %v225_v18 = vpop.eup %224 }
  0x38   :  { %v103_v19 = vmul.f32 %v225_v18, %v216_v17  ;;  %v227_v20 = vpop.eup %226 }
  0x39   :  { %v104_v22 = vmul.f32 %v227_v20, %v216_v17 }
  0x3a   :  { %v106_v21 = vsel %vm105_vm0, %v103_v19, 0.0 }
  0x3b   :  { %107 = vadd.xlane.f32.xlu0 %v106_v21  ;;  %v109_v23 = vsel %vm105_vm0, %v104_v22, 0.0 }
  0x3f   :  { %110 = vadd.xlane.f32.xlu0 %v109_v23 }
  0xc4   :  { %v108_v26 = vpop.xlane.xlu0 %107 }
  0xc5   :  { %v114_v28 = vadd.f32 %v113_v25, %v108_v26 }
  0xc7   :  { %v125_v32 = vrot.slane %v114_v28, %v124_v27 }
  0xc8   :  { %v111_v29 = vpop.xlane.xlu0 %110 }
  0xc9   :  { %v115_v31 = vadd.f32 %v113_v25, %v111_v29 }
  0xcb   :  { %v129_v33 = vrot.slane %v115_v31, %v124_v27 }
  0xcd   :  { %v131_v34 = vsel %vm130_vm1, %v129_v33, %v125_v32 }
  0xce   :  { %v133_v35 = vsel %vm117_vm2, -inf, %v131_v34 }
  0xcf   :  { %v135_v36 = vsel %vm134_vm3, %v133_v35, -inf }
  0xd0   :  { %136 = vmax.xlane.f32.xlu1 %v135_v36 }
 0x159   :  { %v137_v37 = vpop.xlane.xlu1 %136 }
 0x15a   :  { %v138_v38 = vsub.f32 %v133_v35, %v137_v37 }
 0x15c   :  { %v139_v39 = vmul.f32 1.442695, %v138_v38 }
 0x15e   :  { %228 = vpow2.f32 %v139_v39 }
 0x16b   :  { %v229_v40 = vpop.eup %228 }
 0x16c   :  { %v141_v41 = vsel %vm134_vm3, %v229_v40, 0.0 }
 0x16d   :  { %142 = vadd.xlane.f32.xlu1 %v141_v41 }
 0x1f6   :  { %v143_v42 = vpop.xlane.xlu1 %142 }
 0x1f7   :  { %230 = vrcp.f32 %v143_v42 }
 0x204   :  { %v231_v44 = vpop.eup %230 }
 0x205   :  { %v145_v45 = vmul.f32 %v231_v44, %v229_v40 }
 0x207   :  { %v156_v46 = vrot.slane %v145_v45, %v155_v43  ;;  %184 = vst.msk [vmem:[#allocation9] sm:$0x3] %vm134_vm3, %v145_v45  ;;  %v149_v47 = vrot.slane %v145_v45, %v84_v6 }
 0x209   :  { %158 = vbcast.lane.b32.xlu1 %v156_v46, 256  ;;  %151 = vbcast.lane.b32.xlu0 %v149_v47, 256 }
 0x20a   :  { %283 = shalt.err (!%p280_p0)
}
 0x20b   :  { %204 = dma.vmem_to_hbm [thread:$0]  %s202_s5, 32, %s407_s7, [#allocation10]   ;;  %v161_v48 = vld [vmem:[#allocation6 + $0x8] sm:$0xff]  ;;  %v160_v49 = vld [vmem:[#allocation6] sm:$0xff]  ;;  %vm182_vm4 = vcmask 254976  }
 0x20c   :  { %s326_s7 = smov [#allocation8]  }
 0x20d   :  { %s191_s20 = sshll.u32 %s326_s7, 4  ;;  %s192_s20 = int_to_ptr.vmem [resolvable:$true] %s191_s20 }
 0x20e   :  { %s292_s21 = scalar_lea.vmem %s192_s20, 32  ;;  %p297_p2 = scmp.lt.s32.totalorder %s192_s20, %s192_s20 }
 0x20f   :  { %p293_p1 = scmp.ne.s32.totalorder %s192_s20, %s292_s21  ;;  %p298_p3 = scmp.lt.s32.totalorder %s292_s21, %s292_s21 }
 0x211   :  { %p299_p4 = por %p298_p3, %p297_p2 }
 0x213   :  { %p300_p5 = pnand %p299_p4, %p293_p1 }
 0x27b   :  { %v159_v50 = vpop.permute.xlu1 %158  ;;  %v152_v51 = vpop.permute.xlu0 %151 }
 0x27c   :  { %v163_v52 = vmul.f32 %v161_v48, %v159_v50  ;;  %v162_v53 = vmul.f32 %v160_v49, %v152_v51 }
 0x27e   :  { %v171_v54 = vsel %vm105_vm0, %v163_v52, 0.0  ;;  %v164_v55 = vsel %vm105_vm0, %v162_v53, 0.0 }
 0x27f   :  { %v172_v56 = vrot.slane %v171_v54, 4  ;;  %v165_v57 = vrot.slane %v164_v55, 4 }
 0x281   :  { %v173_v58 = vadd.f32 %v172_v56, %v171_v54  ;;  %v166_v59 = vadd.f32 %v165_v57, %v164_v55 }
 0x283   :  { %v174_v60 = vrot.slane %v173_v58, 2  ;;  %v167_v61 = vrot.slane %v166_v59, 2 }
 0x285   :  { %v175_v62 = vadd.f32 %v174_v60, %v173_v58  ;;  %v168_v63 = vadd.f32 %v167_v61, %v166_v59 }
 0x287   :  { %v176_v0 = vrot.slane %v175_v62, 1  ;;  %v169_v1 = vrot.slane %v168_v63, 1 }
 0x289   :  { %v177_v2 = vadd.f32 %v176_v0, %v175_v62  ;;  %v170_v3 = vadd.f32 %v169_v1, %v168_v63 }
 0x28b   :  { %v180_v4 = vsel %vm130_vm1, %v177_v2, %v170_v3 }
 0x28c   :  { %183 = vst.msk [vmem:[#allocation8] sm:$0x3] %vm182_vm4, %v180_v4 }
 0x28d   :  { %303 = shalt.err (!%p300_p5)
}
 0x28e   :  { %194 = dma.vmem_to_hbm [thread:$0]  %s192_s20, 32, %s406_s6, [#allocation5]  }
 0x28f   :  { %316 = dma.done.wait [#allocation5], 32  }
 0x290   :  { %317 = vsyncadd [#allocation5], 4294967264 }
 0x291   :  { %318 = dma.done.wait [#allocation10], 32  }
 0x292   :  { %319 = vsyncadd [#allocation10], 4294967264 }
 0x293   :  { %211 = vsyncpa [#allocation4], 1 }
 0x294   :  { %212 = vsyncpa [#allocation7], 1 }
 0x295   :  { %213 = vsyncpa [#allocation5], 1 }
 0x296   :  { %214 = vsyncpa [#allocation10], 1 }

</bundles_post_ra>
